<compile_context>
chip_gen: v7x
topology: tpu7x:2x2x1
jax: 0.10.0
libtpu: 0.0.40
codegen_flags: <defaults>
</compile_context>

<pallas_src>
import jax
import jax.numpy as jnp
from jax.experimental import pallas as pl
from jax.experimental.pallas import tpu as pltpu


def _round_up(x: int, m: int) -> int:
    return (x + m - 1) // m * m


def splendor_kernel(x_ref, w1_ref, b1_ref, w2_ref, b2_ref, wh_ref, bh_ref,
                    out_ref):
    # x arrives f32; cast to bf16 on the VPU (hidden under the MXU passes).
    x = x_ref[...].astype(jnp.bfloat16)

    # fc_body: Linear -> ReLU -> Linear -> ReLU  (f32 accumulation/activations)
    h1 = jnp.dot(x, w1_ref[...], preferred_element_type=jnp.float32) + b1_ref[...]
    h1 = jnp.maximum(h1, 0.0)                                        # (Bt, H) f32
    h2 = jnp.dot(h1.astype(jnp.bfloat16), w2_ref[...],
                 preferred_element_type=jnp.float32) + b2_ref[...]
    h2 = jnp.maximum(h2, 0.0)                                        # (Bt, H) f32

    # Fused policy|value head: one MXU pass -> lane-dense (Bt, 128) slab.
    # Columns [0, num_actions) = policy logits, column num_actions = raw
    # (pre-tanh) value, remaining columns = zero padding.  No epilogue here:
    # tanh / slicing happen in the wrapper.
    z = jnp.dot(h2.astype(jnp.bfloat16), wh_ref[...],
                preferred_element_type=jnp.float32) + bh_ref[...]
    out_ref[...] = z.astype(out_ref.dtype)                           # bf16 store


def init_params(key, state_dim, hidden_dim, num_actions):
    """Deterministic synthetic init, PyTorch layout semantics (stored (in, out))."""
    ks = jax.random.split(key, 8)

    def lin(kw, kb, fan_in, fan_out):
        bound = 1.0 / jnp.sqrt(fan_in)
        w = jax.random.uniform(kw, (fan_in, fan_out), jnp.float32, -bound, bound)
        bias = jax.random.uniform(kb, (1, fan_out), jnp.float32, -bound, bound)
        return w, bias

    w1, b1 = lin(ks[0], ks[1], state_dim, hidden_dim)
    w2, b2 = lin(ks[2], ks[3], hidden_dim, hidden_dim)
    wp, bp = lin(ks[4], ks[5], hidden_dim, num_actions)
    wv, bv = lin(ks[6], ks[7], hidden_dim, 1)
    return (w1, b1, w2, b2, wp, bp, wv, bv)


def pack_params(params, num_actions):
    """Fuse policy|value heads into one lane-dense head and cast weights to bf16."""
    w1, b1, w2, b2, wp, bp, wv, bv = params
    hidden = w1.shape[1]
    head_out = _round_up(num_actions + 1, 128)          # lane-dense output width

    wh = jnp.zeros((hidden, head_out), jnp.float32)
    wh = wh.at[:, :num_actions].set(wp)
    wh = wh.at[:, num_actions:num_actions + 1].set(wv)
    bh = jnp.zeros((1, head_out), jnp.float32)
    bh = bh.at[:, :num_actions].set(bp)
    bh = bh.at[:, num_actions:num_actions + 1].set(bv)

    # TODO(synk): on v7x, weights could be stored fp8 (e4m3) for 2x MXU rate;
    # kept bf16 here for portability to v5e/v6e.
    return (w1.astype(jnp.bfloat16), b1,
            w2.astype(jnp.bfloat16), b2,
            wh.astype(jnp.bfloat16), bh)


def _batch_tile(b: int, cap: int = 1024) -> int:
    """Batch tile: 16-row (bf16 sublane) granule, capped, and sized so the grid
    has >= 2 steps whenever B exceeds one tile (v7x megacore)."""
    bt = _round_up(max((b + 1) // 2, 1), 16)
    return min(cap, bt)


def splendor_forward(x_nchw, packed_params, num_actions):
    """x_nchw: (B, C, H, W) float32 -> (policy_logits (B, A), value (B, 1))."""
    b = x_nchw.shape[0]
    x_flat = x_nchw.reshape(b, -1)                       # keep f32; kernel casts
    state_dim = x_flat.shape[1]

    w1, b1, w2, b2, wh, bh = packed_params
    head_out = wh.shape[1]

    bt = _batch_tile(b)
    b_pad = _round_up(b, bt)
    if b_pad != b:
        x_flat = jnp.pad(x_flat, ((0, b_pad - b), (0, 0)))
    grid = (b_pad // bt,)

    out = pl.pallas_call(
        splendor_kernel,
        out_shape=jax.ShapeDtypeStruct((b_pad, head_out), jnp.bfloat16),
        grid=grid,
        in_specs=[
            pl.BlockSpec((bt, state_dim), lambda i: (i, 0)),
            pl.BlockSpec(w1.shape, lambda i: (0, 0)),   # constant block ->
            pl.BlockSpec(b1.shape, lambda i: (0, 0)),   # weights DMA'd once,
            pl.BlockSpec(w2.shape, lambda i: (0, 0)),   # resident across the
            pl.BlockSpec(b2.shape, lambda i: (0, 0)),   # batch grid.
            pl.BlockSpec(wh.shape, lambda i: (0, 0)),
            pl.BlockSpec(bh.shape, lambda i: (0, 0)),
        ],
        out_specs=pl.BlockSpec((bt, head_out), lambda i: (i, 0)),
        compiler_params=pltpu.CompilerParams(
            dimension_semantics=("parallel",)),          # v7x: 2 TCs over batch
    )(x_flat, w1, b1, w2, b2, wh, bh)

    # Wrapper epilogue: slice the lane-dense slab; tanh only on the value
    # column, in f32.
    policy_logits = out[:b, :num_actions].astype(jnp.float32)
    value = jnp.tanh(out[:b, num_actions:num_actions + 1].astype(jnp.float32))
    return policy_logits, value


def reference_forward(x_nchw, params):
    """Pure-JAX f32 reference mirroring the PyTorch forward."""
    w1, b1, w2, b2, wp, bp, wv, bv = params
    x = x_nchw.reshape(x_nchw.shape[0], -1)
    h = jnp.maximum(x @ w1 + b1, 0.0)
    h = jnp.maximum(h @ w2 + b2, 0.0)
    pol = h @ wp + bp
    val = jnp.tanh(h @ wv + bv)
    return pol, val


if __name__ == "__main__":
    # Shapes consistent with the module:
    #   state_shape = (4, 8, 8) -> state_dim = 256, hidden_dim = 256 (fixed),
    #   num_actions = 45, batch = 2.
    batch = 2
    state_shape = (4, 8, 8)
    state_dim = 4 * 8 * 8
    hidden_dim = 256
    num_actions = 45

    key = jax.random.PRNGKey(0)
    k_x, k_p = jax.random.split(key)
    x = jax.random.normal(k_x, (batch,) + state_shape, dtype=jnp.float32)
    params = init_params(k_p, state_dim, hidden_dim, num_actions)
    packed = pack_params(params, num_actions)

    policy_logits, value = splendor_forward(x, packed, num_actions)
    policy_logits = jax.block_until_ready(policy_logits)
    value = jax.block_until_ready(value)

    assert policy_logits.shape == (batch, num_actions)
    assert value.shape == (batch, 1)

    # Sanity check against the f32 reference (tolerance sized for bf16
    # weights / activations / output slab).
    ref_pol, ref_val = reference_forward(x, params)
    assert jnp.allclose(policy_logits, ref_pol, atol=3e-2, rtol=3e-2), (
        jnp.max(jnp.abs(policy_logits - ref_pol)))
    assert jnp.allclose(value, ref_val, atol=3e-2, rtol=3e-2), (
        jnp.max(jnp.abs(value - ref_val)))

    print("KERNEL_OK")
</pallas_src>

<mosaic_0001>
module attributes {stable_mosaic.version = 11 : i64} {
  func.func @splendor_kernel(%arg0: i32, %arg1: memref<16x256xf32, #tpu.memory_space<vmem>>, %arg2: memref<256x256xbf16, #tpu.memory_space<vmem>>, %arg3: memref<1x256xf32, #tpu.memory_space<vmem>>, %arg4: memref<256x256xbf16, #tpu.memory_space<vmem>>, %arg5: memref<1x256xf32, #tpu.memory_space<vmem>>, %arg6: memref<256x128xbf16, #tpu.memory_space<vmem>>, %arg7: memref<1x128xf32, #tpu.memory_space<vmem>>, %arg8: memref<16x128xbf16, #tpu.memory_space<vmem>>) attributes {dimension_semantics = [#tpu.dimension_semantics<parallel>], iteration_bounds = array<i64: 1>, scalar_prefetch = 0 : i64, scratch_operands = 0 : i64, tpu.core_type = #tpu.core_type<tc>, window_params = [{transform_indices = @transform_0, window_bounds = array<i64: 16, 256>}, {pipeline_mode = #tpu.pipeline_mode<synchronous>, transform_indices = @transform_1, window_bounds = array<i64: 256, 256>}, {pipeline_mode = #tpu.pipeline_mode<synchronous>, transform_indices = @transform_2, window_bounds = array<i64: 1, 256>}, {pipeline_mode = #tpu.pipeline_mode<synchronous>, transform_indices = @transform_3, window_bounds = array<i64: 256, 256>}, {pipeline_mode = #tpu.pipeline_mode<synchronous>, transform_indices = @transform_4, window_bounds = array<i64: 1, 256>}, {pipeline_mode = #tpu.pipeline_mode<synchronous>, transform_indices = @transform_5, window_bounds = array<i64: 256, 128>}, {pipeline_mode = #tpu.pipeline_mode<synchronous>, transform_indices = @transform_6, window_bounds = array<i64: 1, 128>}, {transform_indices = @transform_7, window_bounds = array<i64: 16, 128>}]} {
    %c0 = arith.constant 0 : index
    %c0_0 = arith.constant 0 : index
    %0 = vector.load %arg1[%c0, %c0_0] : memref<16x256xf32, #tpu.memory_space<vmem>>, vector<16x256xf32>
    %1 = arith.truncf %0 : vector<16x256xf32> to vector<16x256xbf16>
    %c0_1 = arith.constant 0 : index
    %c0_2 = arith.constant 0 : index
    %2 = vector.load %arg2[%c0_1, %c0_2] : memref<256x256xbf16, #tpu.memory_space<vmem>>, vector<256x256xbf16>
    %cst = arith.constant dense<0.000000e+00> : vector<16x256xf32>
    %3 = tpu.matmul %1, %2, %cst {dimension_numbers = #tpu.dot_dimension_numbers<[1], [0], [0], [1], [0, 0, 1, 1], [], []>} : vector<16x256xbf16>, vector<256x256xbf16>, vector<16x256xf32> -> vector<16x256xf32>
    %c0_3 = arith.constant 0 : index
    %c0_4 = arith.constant 0 : index
    %4 = vector.load %arg3[%c0_3, %c0_4] : memref<1x256xf32, #tpu.memory_space<vmem>>, vector<1x256xf32>
    %5 = vector.broadcast %4 : vector<1x256xf32> to vector<16x256xf32>
    %6 = arith.addf %3, %5 : vector<16x256xf32>
    %cst_5 = arith.constant 0.000000e+00 : f32
    %7 = vector.broadcast %cst_5 : f32 to vector<16x256xf32>
    %8 = arith.maximumf %6, %7 : vector<16x256xf32>
    %9 = arith.truncf %8 : vector<16x256xf32> to vector<16x256xbf16>
    %c0_6 = arith.constant 0 : index
    %c0_7 = arith.constant 0 : index
    %10 = vector.load %arg4[%c0_6, %c0_7] : memref<256x256xbf16, #tpu.memory_space<vmem>>, vector<256x256xbf16>
    %cst_8 = arith.constant dense<0.000000e+00> : vector<16x256xf32>
    %11 = tpu.matmul %9, %10, %cst_8 {dimension_numbers = #tpu.dot_dimension_numbers<[1], [0], [0], [1], [0, 0, 1, 1], [], []>} : vector<16x256xbf16>, vector<256x256xbf16>, vector<16x256xf32> -> vector<16x256xf32>
    %c0_9 = arith.constant 0 : index
    %c0_10 = arith.constant 0 : index
    %12 = vector.load %arg5[%c0_9, %c0_10] : memref<1x256xf32, #tpu.memory_space<vmem>>, vector<1x256xf32>
    %13 = vector.broadcast %12 : vector<1x256xf32> to vector<16x256xf32>
    %14 = arith.addf %11, %13 : vector<16x256xf32>
    %cst_11 = arith.constant 0.000000e+00 : f32
    %15 = vector.broadcast %cst_11 : f32 to vector<16x256xf32>
    %16 = arith.maximumf %14, %15 : vector<16x256xf32>
    %17 = arith.truncf %16 : vector<16x256xf32> to vector<16x256xbf16>
    %c0_12 = arith.constant 0 : index
    %c0_13 = arith.constant 0 : index
    %18 = vector.load %arg6[%c0_12, %c0_13] : memref<256x128xbf16, #tpu.memory_space<vmem>>, vector<256x128xbf16>
    %cst_14 = arith.constant dense<0.000000e+00> : vector<16x128xf32>
    %19 = tpu.matmul %17, %18, %cst_14 {dimension_numbers = #tpu.dot_dimension_numbers<[1], [0], [0], [1], [0, 0, 1, 1], [], []>} : vector<16x256xbf16>, vector<256x128xbf16>, vector<16x128xf32> -> vector<16x128xf32>
    %c0_15 = arith.constant 0 : index
    %c0_16 = arith.constant 0 : index
    %20 = vector.load %arg7[%c0_15, %c0_16] : memref<1x128xf32, #tpu.memory_space<vmem>>, vector<1x128xf32>
    %21 = vector.broadcast %20 : vector<1x128xf32> to vector<16x128xf32>
    %22 = arith.addf %19, %21 : vector<16x128xf32>
    %23 = arith.truncf %22 : vector<16x128xf32> to vector<16x128xbf16>
    %c0_17 = arith.constant 0 : index
    %c0_18 = arith.constant 0 : index
    %24 = vector.load %arg8[%c0_17, %c0_18] : memref<16x128xbf16, #tpu.memory_space<vmem>>, vector<16x128xbf16>
    tpu.vector_store %arg8[%c0_17, %c0_18], %23 {strides = array<i32>} : memref<16x128xbf16, #tpu.memory_space<vmem>>, vector<16x128xbf16>,
    return
  }
  func.func @transform_0(%arg0: i32) -> (i32, i32) {
    %c0_i32 = arith.constant 0 : i32
    %c0_i32_0 = arith.constant 0 : i32
    return %arg0, %c0_i32 : i32, i32
  }
  func.func @transform_1(%arg0: i32) -> (i32, i32) {
    %c0_i32 = arith.constant 0 : i32
    %c0_i32_0 = arith.constant 0 : i32
    %c0_i32_1 = arith.constant 0 : i32
    return %c0_i32, %c0_i32_0 : i32, i32
  }
  func.func @transform_2(%arg0: i32) -> (i32, i32) {
    %c0_i32 = arith.constant 0 : i32
    %c0_i32_0 = arith.constant 0 : i32
    %c0_i32_1 = arith.constant 0 : i32
    return %c0_i32, %c0_i32_0 : i32, i32
  }
  func.func @transform_3(%arg0: i32) -> (i32, i32) {
    %c0_i32 = arith.constant 0 : i32
    %c0_i32_0 = arith.constant 0 : i32
    %c0_i32_1 = arith.constant 0 : i32
    return %c0_i32, %c0_i32_0 : i32, i32
  }
  func.func @transform_4(%arg0: i32) -> (i32, i32) {
    %c0_i32 = arith.constant 0 : i32
    %c0_i32_0 = arith.constant 0 : i32
    %c0_i32_1 = arith.constant 0 : i32
    return %c0_i32, %c0_i32_0 : i32, i32
  }
  func.func @transform_5(%arg0: i32) -> (i32, i32) {
    %c0_i32 = arith.constant 0 : i32
    %c0_i32_0 = arith.constant 0 : i32
    %c0_i32_1 = arith.constant 0 : i32
    return %c0_i32, %c0_i32_0 : i32, i32
  }
  func.func @transform_6(%arg0: i32) -> (i32, i32) {
    %c0_i32 = arith.constant 0 : i32
    %c0_i32_0 = arith.constant 0 : i32
    %c0_i32_1 = arith.constant 0 : i32
    return %c0_i32, %c0_i32_0 : i32, i32
  }
  func.func @transform_7(%arg0: i32) -> (i32, i32) {
    %c0_i32 = arith.constant 0 : i32
    %c0_i32_0 = arith.constant 0 : i32
    return %arg0, %c0_i32 : i32, i32
  }
}

</mosaic_0001>

<bundles_post_ra>
// kernel: tpu_custom_call.1
= control target key start
LH: loop header
LB: loop body
LE: loop exit
PB: predicated region body
PF: predicated region fallthrough
CT: control target
= control target key end

     0   :  { %12 = vsyncpa [#allocation3], 0  ;;  %s1292_s0 = inlined_call_operand.hbm [shape: f32[16,256], index: 0, kind: input, shape index: {}]   ;;  %s1293_s1 = inlined_call_operand.hbm [shape: bf16[256,256], index: 1, kind: input, shape index: {}]   ;;  %s1294_s2 = inlined_call_operand.vmem [shape: f32[1,256], index: 2, kind: input, shape index: {}]   ;;  %s1295_s3 = inlined_call_operand.hbm [shape: bf16[256,256], index: 3, kind: input, shape index: {}]   ;;  %s1296_s4 = inlined_call_operand.vmem [shape: f32[1,256], index: 4, kind: input, shape index: {}]   ;;  %s1297_s5 = inlined_call_operand.hbm [shape: bf16[256,128], index: 5, kind: input, shape index: {}]   ;;  %s1298_s6 = inlined_call_operand.vmem [shape: f32[1,128], index: 6, kind: input, shape index: {}]   ;;  %s1299_s7 = inlined_call_operand.hbm [shape: bf16[16,128], index: 7, kind: output, shape index: {}]  }
   0x1   :  { %13 = vsyncpa [#allocation6], 0 }
   0x2   :  { %14 = vsyncpa [#allocation9], 0 }
   0x3   :  { %15 = vsyncpa [#allocation4], 0  ;;  %s1153_s24 = smov [#allocation5]   ;;  %s1035_s28 = scalar_lea.hbm %s1293_s1, 4096 }
   0x4   :  { %s33_s25 = sshll.u32 %s1153_s24, 4  ;;  %p1036_p0 = scmp.ne.s32.totalorder %s1293_s1, %s1035_s28  ;;  %s34_s25 = int_to_ptr.vmem [resolvable:$true] %s33_s25 }
   0x5   :  { %p1039_p1 = scmp.lt.u32.totalorder %s1035_s28, %s1293_s1 }
   0x7   :  { %p1041_p2 = pnand %p1039_p1, %p1036_p0 }
   0x9   :  { %1044 = shalt.err (!%p1041_p2)
}
   0xa   :  { %s1045_s10 = scalar_lea.vmem %s34_s25, 4096  ;;  %p1050_p4 = scmp.lt.s32.totalorder %s34_s25, %s34_s25 }
   0xb   :  { %p1046_p3 = scmp.ne.s32.totalorder %s34_s25, %s1045_s10  ;;  %p1051_p5 = scmp.lt.s32.totalorder %s1045_s10, %s1045_s10 }
   0xd   :  { %p1052_p6 = por %p1051_p5, %p1050_p4 }
   0xf   :  { %p1053_p7 = pnand %p1052_p6, %p1046_p3 }
  0x11   :  { %1056 = shalt.err (!%p1053_p7)
}
  0x12   :  { %s1154_s11 = smov 128   ;;  %s1155_s12 = smov 8  }
  0x13   :  { %39 = dma.hbm_to_vmem [thread:$0]  %s1293_s1, 4096, %s34_s25, [#allocation6], %s1154_s11, %s1154_s11, %s1155_s12  }
  0x14   :  { %s1156_s15 = smov [#allocation2]   ;;  %s1057_s19 = scalar_lea.hbm %s1292_s0, 512 }
  0x15   :  { %s21_s16 = sshll.u32 %s1156_s15, 4  ;;  %p1058_p8 = scmp.ne.s32.totalorder %s1292_s0, %s1057_s19  ;;  %s22_s16 = int_to_ptr.vmem [resolvable:$true] %s21_s16 }
  0x16   :  { %p1061_p9 = scmp.lt.u32.totalorder %s1057_s19, %s1292_s0 }
  0x18   :  { %p1063_p10 = pnand %p1061_p9, %p1058_p8 }
  0x1a   :  { %1066 = shalt.err (!%p1063_p10)
}
  0x1b   :  { %s1067_s24 = scalar_lea.vmem %s22_s16, 512  ;;  %p1072_p12 = scmp.lt.s32.totalorder %s22_s16, %s22_s16 }
  0x1c   :  { %p1068_p11 = scmp.ne.s32.totalorder %s22_s16, %s1067_s24  ;;  %p1073_p13 = scmp.lt.s32.totalorder %s1067_s24, %s1067_s24 }
  0x1e   :  { %p1074_p0 = por %p1073_p13, %p1072_p12 }
  0x20   :  { %p1075_p1 = pnand %p1074_p0, %p1068_p11 }
  0x22   :  { %1078 = shalt.err (!%p1075_p1)
}
  0x23   :  { %s1157_s1 = smov 256   ;;  %s1158_s25 = smov 16  }
  0x24   :  { %27 = dma.hbm_to_vmem [thread:$0]  %s1292_s0, 512, %s22_s16, [#allocation3], %s1157_s1, %s1157_s1, %s1158_s25  }
  0x25   :  { %s1159_s28 = smov [#allocation7]   ;;  %s1160_s30 = smov [#allocation8]  }
  0x26   :  { %s47_s29 = sshll.u32 %s1159_s28, 4  ;;  %s61_s8 = sshll.u32 %s1160_s30, 4  ;;  %s48_s29 = int_to_ptr.vmem [resolvable:$true] %s47_s29  ;;  %s1231_s8 = int_to_ptr.vmem [resolvable:$true] %s61_s8 }
  0x27   :  { %s1079_s13 = scalar_lea.hbm %s1295_s3, 4096 }
  0x28   :  { %p1080_p2 = scmp.ne.s32.totalorder %s1295_s3, %s1079_s13  ;;  %p1083_p3 = scmp.lt.u32.totalorder %s1079_s13, %s1295_s3 }
  0x2a   :  { %p1085_p4 = pnand %p1083_p3, %p1080_p2 }
  0x2c   :  { %1088 = shalt.err (!%p1085_p4)
}
  0x2d   :  { %s1089_s0 = scalar_lea.vmem %s48_s29, 4096  ;;  %p1094_p6 = scmp.lt.s32.totalorder %s48_s29, %s48_s29 }
  0x2e   :  { %p1090_p5 = scmp.ne.s32.totalorder %s48_s29, %s1089_s0  ;;  %p1095_p7 = scmp.lt.s32.totalorder %s1089_s0, %s1089_s0 }
  0x30   :  { %p1096_p8 = por %p1095_p7, %p1094_p6 }
  0x32   :  { %p1097_p9 = pnand %p1096_p8, %p1090_p5 }
  0x34   :  { %1100 = shalt.err (!%p1097_p9)
}
  0x35   :  { %53 = dma.hbm_to_vmem [thread:$0]  %s1295_s3, 4096, %s48_s29, [#allocation6], %s1154_s11, %s1154_s11, %s1155_s12  }
  0x36   :  { %s1101_s22 = scalar_lea.hbm %s1297_s5, 2048 }
  0x37   :  { %p1102_p10 = scmp.ne.s32.totalorder %s1297_s5, %s1101_s22  ;;  %p1105_p11 = scmp.lt.u32.totalorder %s1101_s22, %s1297_s5 }
  0x39   :  { %p1107_p12 = pnand %p1105_p11, %p1102_p10 }
  0x3b   :  { %1110 = shalt.err (!%p1107_p12)
}
  0x3c   :  { %s1111_s26 = scalar_lea.vmem %s1231_s8, 2048  ;;  %p1116_p0 = scmp.lt.s32.totalorder %s1231_s8, %s1231_s8 }
  0x3d   :  { %p1112_p13 = scmp.ne.s32.totalorder %s1231_s8, %s1111_s26  ;;  %p1117_p1 = scmp.lt.s32.totalorder %s1111_s26, %s1111_s26 }
  0x3f   :  { %p1118_p2 = por %p1117_p1, %p1116_p0 }
  0x41   :  { %p1119_p3 = pnand %p1118_p2, %p1112_p13 }
  0x43   :  { %1122 = shalt.err (!%p1119_p3)
}
  0x44   :  { %s1161_s3 = smov 64   ;;  %s1162_s11 = smov 4  }
  0x45   :  { %67 = dma.hbm_to_vmem [thread:$0]  %s1297_s5, 2048, %s1231_s8, [#allocation9], %s1161_s3, %s1161_s3, %s1162_s11  }
  0x46   :  { %1145 = dma.done.wait [#allocation3], 512  }
  0x47   :  { %1146 = vsyncadd [#allocation3], 4294966784 }
  0x48   :  { %1147 = dma.done.wait [#allocation6], 8192  }
  0x49   :  { %1148 = vsyncadd [#allocation6], 4294959104 }
  0x4a   :  { %1149 = dma.done.wait [#allocation9], 2048  }
  0x4b   :  { %1150 = vsyncadd [#allocation9], 4294965248  ;;  %v923_v0 = vld [vmem:[#allocation5 + $0x4] ss:$8 sps:$4 sm:$0xff]   ;;  %v925_v1 = vld [vmem:[#allocation5] ss:$8 sps:$4 sm:$0xff]  }
  0x4c   :  { %293 = vmatprep.subr.bf16.mxu0 %v923_v0  ;;  %v926_v2 = vld [vmem:[#allocation5 + $0x14] ss:$8 sps:$4 sm:$0xff]   ;;  %v928_v3 = vld [vmem:[#allocation5 + $0x10] ss:$8 sps:$4 sm:$0xff]   ;;  %v929_v4 = vld [vmem:[#allocation5 + $0x24] ss:$8 sps:$4 sm:$0xff]  }
  0x4d   :  { %294 = vmatpush1.bf16.msra.mxu0 %v925_v1  ;;  %v931_v5 = vld [vmem:[#allocation5 + $0x20] ss:$8 sps:$4 sm:$0xff]   ;;  %v932_v6 = vld [vmem:[#allocation5 + $0x34] ss:$8 sps:$4 sm:$0xff]   ;;  %v934_v7 = vld [vmem:[#allocation5 + $0x30] ss:$8 sps:$4 sm:$0xff]  }
  0x4e   :  { %295 = vmatprep.subr.bf16.mxu0 %v926_v2  ;;  %v935_v8 = vld [vmem:[#allocation5 + $0x44] ss:$8 sps:$4 sm:$0xff]   ;;  %v937_v9 = vld [vmem:[#allocation5 + $0x40] ss:$8 sps:$4 sm:$0xff]   ;;  %v938_v10 = vld [vmem:[#allocation5 + $0x54] ss:$8 sps:$4 sm:$0xff]  }
  0x4f   :  { %v940_v11 = vld [vmem:[#allocation5 + $0x50] ss:$8 sps:$4 sm:$0xff]   ;;  %v941_v12 = vld [vmem:[#allocation5 + $0x64] ss:$8 sps:$4 sm:$0xff]   ;;  %v943_v15 = vld [vmem:[#allocation5 + $0x60] ss:$8 sps:$4 sm:$0xff]  }
  0x50   :  { %v84_v13 = vld [vmem:[#allocation2 + $0x8] sm:$0xff]  ;;  %v86_v14 = vld [vmem:[#allocation2 + $0x18] sm:$0xff]  ;;  %v83_v55 = vld [vmem:[#allocation2] sm:$0xff]  ;;  %s1163_s8 = smov [#allocation10]  }
  0x51   :  { %296 = vmatpush1.bf16.msra.mxu0 %v928_v3  ;;  %v944_v16 = vld [vmem:[#allocation5 + $0x74] ss:$8 sps:$4 sm:$0xff]   ;;  %v88_v17 = vpack.c.bf16 %v86_v14, %v84_v13  ;;  %v971_v18 = vld [vmem:[#allocation7 + $0x4] ss:$8 sps:$4 sm:$0xff]   ;;  %v973_v19 = vld [vmem:[#allocation7] ss:$8 sps:$4 sm:$0xff]  }
  0x52   :  { %297 = vmatprep.subr.bf16.mxu0 %v929_v4  ;;  %v974_v20 = vld [vmem:[#allocation7 + $0x14] ss:$8 sps:$4 sm:$0xff]   ;;  %546 = vmatprep.subr.bf16.mxu1 %v971_v18  ;;  %v976_v21 = vld [vmem:[#allocation7 + $0x10] ss:$8 sps:$4 sm:$0xff]   ;;  %v977_v23 = vld [vmem:[#allocation7 + $0x24] ss:$8 sps:$4 sm:$0xff]  }
  0x53   :  { %325 = vmatprep.mubr.bf16.mxu0 %v88_v17  ;;  %547 = vmatpush1.bf16.msra.mxu1 %v973_v19  ;;  %v946_v22 = vld [vmem:[#allocation5 + $0x70] ss:$8 sps:$4 sm:$0xff]   ;;  %v947_v24 = vld [vmem:[#allocation5 + $0x84] ss:$8 sps:$4 sm:$0xff]   ;;  %v979_v25 = vld [vmem:[#allocation7 + $0x20] ss:$8 sps:$4 sm:$0xff]   ;;  %v123_v17 = vlaneseq }
  0x54   :  { %548 = vmatprep.subr.bf16.mxu1 %v974_v20  ;;  %v949_v26 = vld [vmem:[#allocation5 + $0x80] ss:$8 sps:$4 sm:$0xff]   ;;  %v980_v27 = vld [vmem:[#allocation7 + $0x34] ss:$8 sps:$4 sm:$0xff]   ;;  %v982_v29 = vld [vmem:[#allocation7 + $0x30] ss:$8 sps:$4 sm:$0xff]  }
  0x55   :  { %298 = vmatpush1.bf16.msra.mxu0 %v931_v5  ;;  %v950_v28 = vld [vmem:[#allocation5 + $0x94] ss:$8 sps:$4 sm:$0xff]   ;;  %v952_v30 = vld [vmem:[#allocation5 + $0x90] ss:$8 sps:$4 sm:$0xff]   ;;  %v983_v31 = vld [vmem:[#allocation7 + $0x44] ss:$8 sps:$4 sm:$0xff]  }
  0x56   :  { %299 = vmatprep.subr.bf16.mxu0 %v932_v6  ;;  %v953_v32 = vld [vmem:[#allocation5 + $0xa4] ss:$8 sps:$4 sm:$0xff]   ;;  %v955_v33 = vld [vmem:[#allocation5 + $0xa0] ss:$8 sps:$4 sm:$0xff]   ;;  %v956_v35 = vld [vmem:[#allocation5 + $0xb4] ss:$8 sps:$4 sm:$0xff]  }
  0x57   :  { %549 = vmatpush1.bf16.msra.mxu1 %v976_v21  ;;  %v985_v34 = vld [vmem:[#allocation7 + $0x40] ss:$8 sps:$4 sm:$0xff]   ;;  %v986_v36 = vld [vmem:[#allocation7 + $0x54] ss:$8 sps:$4 sm:$0xff]   ;;  %v988_v37 = vld [vmem:[#allocation7 + $0x50] ss:$8 sps:$4 sm:$0xff]  }
  0x58   :  { %550 = vmatprep.subr.bf16.mxu1 %v977_v23  ;;  %v958_v38 = vld [vmem:[#allocation5 + $0xb0] ss:$8 sps:$4 sm:$0xff]   ;;  %v989_v39 = vld [vmem:[#allocation7 + $0x64] ss:$8 sps:$4 sm:$0xff]   ;;  %v991_v41 = vld [vmem:[#allocation7 + $0x60] ss:$8 sps:$4 sm:$0xff]  }
  0x59   :  { %300 = vmatpush1.bf16.msra.mxu0 %v934_v7  ;;  %v959_v40 = vld [vmem:[#allocation5 + $0xc4] ss:$8 sps:$4 sm:$0xff]   ;;  %v961_v42 = vld [vmem:[#allocation5 + $0xc0] ss:$8 sps:$4 sm:$0xff]   ;;  %v992_v43 = vld [vmem:[#allocation7 + $0x74] ss:$8 sps:$4 sm:$0xff]  }
  0x5a   :  { %301 = vmatprep.subr.bf16.mxu0 %v935_v8  ;;  %v962_v44 = vld [vmem:[#allocation5 + $0xd4] ss:$8 sps:$4 sm:$0xff]   ;;  %v994_v45 = vld [vmem:[#allocation7 + $0x70] ss:$8 sps:$4 sm:$0xff]   ;;  %v995_v47 = vld [vmem:[#allocation7 + $0x84] ss:$8 sps:$4 sm:$0xff]  }
  0x5b   :  { %551 = vmatpush1.bf16.msra.mxu1 %v979_v25  ;;  %v964_v46 = vld [vmem:[#allocation5 + $0xd0] ss:$8 sps:$4 sm:$0xff]   ;;  %v965_v48 = vld [vmem:[#allocation5 + $0xe4] ss:$8 sps:$4 sm:$0xff]   ;;  %v997_v49 = vld [vmem:[#allocation7 + $0x80] ss:$8 sps:$4 sm:$0xff]  }
  0x5c   :  { %552 = vmatprep.subr.bf16.mxu1 %v980_v27  ;;  %v967_v50 = vld [vmem:[#allocation5 + $0xe0] ss:$8 sps:$4 sm:$0xff]   ;;  %v998_v51 = vld [vmem:[#allocation7 + $0x94] ss:$8 sps:$4 sm:$0xff]   ;;  %v970_v53 = vld [vmem:[#allocation5 + $0xf0] ss:$8 sps:$4 sm:$0xff]  }
  0x5d   :  { %302 = vmatpush1.bf16.msra.mxu0 %v937_v9  ;;  %v968_v52 = vld [vmem:[#allocation5 + $0xf4] ss:$8 sps:$4 sm:$0xff]   ;;  %v1000_v54 = vld [vmem:[#allocation7 + $0x90] ss:$8 sps:$4 sm:$0xff]   ;;  %v1001_v57 = vld [vmem:[#allocation7 + $0xa4] ss:$8 sps:$4 sm:$0xff]  }
  0x5e   :  { %303 = vmatprep.subr.bf16.mxu0 %v938_v10  ;;  %v85_v56 = vld [vmem:[#allocation2 + $0x10] sm:$0xff]  ;;  %v1003_v59 = vld [vmem:[#allocation7 + $0xa0] ss:$8 sps:$4 sm:$0xff]   ;;  %v1007_v62 = vld [vmem:[#allocation7 + $0xc4] ss:$8 sps:$4 sm:$0xff]   ;;  %v124_v18 = vshrl.u32 %v123_v17, 7 }
  0x5f   :  { %553 = vmatpush1.bf16.msra.mxu1 %v982_v29  ;;  %v87_v58 = vpack.c.bf16 %v85_v56, %v83_v55  ;;  %v1004_v60 = vld [vmem:[#allocation7 + $0xb4] ss:$8 sps:$4 sm:$0xff]   ;;  %v1006_v61 = vld [vmem:[#allocation7 + $0xb0] ss:$8 sps:$4 sm:$0xff]   ;;  %v1009_v63 = vld [vmem:[#allocation7 + $0xc0] ss:$8 sps:$4 sm:$0xff]  }
  0x60   :  { %554 = vmatprep.subr.bf16.mxu1 %v983_v31  ;;  %v1010_v0 = vld [vmem:[#allocation7 + $0xd4] ss:$8 sps:$4 sm:$0xff]   ;;  %v1012_v1 = vld [vmem:[#allocation7 + $0xd0] ss:$8 sps:$4 sm:$0xff]   ;;  %v1013_v2 = vld [vmem:[#allocation7 + $0xe4] ss:$8 sps:$4 sm:$0xff]  }
  0x61   :  { %304 = vmatpush1.bf16.msra.mxu0 %v940_v11  ;;  %v1015_v3 = vld [vmem:[#allocation7 + $0xe0] ss:$8 sps:$4 sm:$0xff]   ;;  %v1016_v4 = vld [vmem:[#allocation7 + $0xf4] ss:$8 sps:$4 sm:$0xff]   ;;  %v1018_v5 = vld [vmem:[#allocation7 + $0xf0] ss:$8 sps:$4 sm:$0xff]  }
  0x62   :  { %305 = vmatprep.subr.bf16.mxu0 %v941_v12  ;;  %v1019_v6 = vld [vmem:[#allocation8 + $0x40] sm:$0xff]   ;;  %v1021_v8 = vld [vmem:[#allocation8 + $0x48] sm:$0xff]   ;;  %v1023_v10 = vld [vmem:[#allocation8 + $0x50] sm:$0xff]   ;;  %v125_v19 = vsub.s32 0, %v124_v18  ;;  %v129_v21 = vsub.s32 1, %v124_v18  ;;  %s786_s9 = sshll.u32 %s1163_s8, 4  ;;  %s787_s9 = int_to_ptr.vmem [resolvable:$true] %s786_s9 }
  0x63   :  { %555 = vmatpush1.bf16.msra.mxu1 %v985_v34  ;;  %v1020_v7 = vld [vmem:[#allocation8] sm:$0xff]   ;;  %v1022_v9 = vld [vmem:[#allocation8 + $0x8] sm:$0xff]   ;;  %v1024_v11 = vld [vmem:[#allocation8 + $0x10] sm:$0xff]   ;;  %s1123_s10 = scalar_lea.vmem %s787_s9, 128  ;;  %p1128_p5 = scmp.lt.s32.totalorder %s787_s9, %s787_s9 }
  0x64   :  { %556 = vmatprep.subr.bf16.mxu1 %v986_v36  ;;  %v1025_v12 = vld [vmem:[#allocation8 + $0x58] sm:$0xff]   ;;  %v1027_v14 = vld [vmem:[#allocation8 + $0x60] sm:$0xff]   ;;  %p1124_p4 = scmp.ne.s32.totalorder %s787_s9, %s1123_s10  ;;  %p1129_p6 = scmp.lt.s32.totalorder %s1123_s10, %s1123_s10 }
  0x65   :  { %306 = vmatpush1.bf16.msra.mxu0 %v943_v15  ;;  %v1026_v13 = vld [vmem:[#allocation8 + $0x18] sm:$0xff]   ;;  %v1028_v15 = vld [vmem:[#allocation8 + $0x20] sm:$0xff]  }
  0x66   :  { %307 = vmatprep.subr.bf16.mxu0 %v944_v16  ;;  %v1029_v16 = vld [vmem:[#allocation8 + $0x68] sm:$0xff]   ;;  %v121_v20 = vld [vmem:[%s1294_s2] sm:$0x3]  ;;  %p1130_p7 = por %p1129_p6, %p1128_p5 }
  0x67   :  { %557 = vmatpush1.bf16.msra.mxu1 %v988_v37  ;;  %v130_v23 = vrot.slane %v121_v20, %v129_v21 }
  0x68   :  { %558 = vmatprep.subr.bf16.mxu1 %v989_v39  ;;  %v1031_v39 = vld [vmem:[#allocation8 + $0x70] sm:$0xff]   ;;  %p1131_p8 = pnand %p1130_p7, %p1124_p4 }
  0x69   :  { %308 = vmatpush1.bf16.msra.mxu0 %v946_v22  ;;  %v126_v22 = vrot.slane %v121_v20, %v125_v19 }
  0x6a   :  { %309 = vmatprep.subr.bf16.mxu0 %v947_v24 }
  0x6b   :  { %559 = vmatpush1.bf16.msra.mxu1 %v991_v41  ;;  %v1033_v41 = vld [vmem:[#allocation8 + $0x78] sm:$0xff]  }
  0x6c   :  { %560 = vmatprep.subr.bf16.mxu1 %v992_v43  ;;  %v374_v43 = vld [vmem:[%s1296_s4] sm:$0x3] }
  0x6d   :  { %310 = vmatpush1.bf16.msra.mxu0 %v949_v26 }
  0x6e   :  { %311 = vmatprep.subr.bf16.mxu0 %v950_v28 }
  0x6f   :  { %561 = vmatpush1.bf16.msra.mxu1 %v994_v45  ;;  %v383_v45 = vrot.slane %v374_v43, %v129_v21 }
  0x70   :  { %562 = vmatprep.subr.bf16.mxu1 %v995_v47 }
  0x71   :  { %312 = vmatpush1.bf16.msra.mxu0 %v952_v30 }
  0x72   :  { %313 = vmatprep.subr.bf16.mxu0 %v953_v32 }
  0x73   :  { %563 = vmatpush1.bf16.msra.mxu1 %v997_v49 }
  0x74   :  { %564 = vmatprep.subr.bf16.mxu1 %v998_v51 }
  0x75   :  { %314 = vmatpush1.bf16.msra.mxu0 %v955_v33 }
  0x76   :  { %315 = vmatprep.subr.bf16.mxu0 %v956_v35 }
  0x77   :  { %565 = vmatpush1.bf16.msra.mxu1 %v1000_v54 }
  0x78   :  { %566 = vmatprep.subr.bf16.mxu1 %v1001_v57 }
  0x79   :  { %316 = vmatpush1.bf16.msra.mxu0 %v958_v38  ;;  %v1030_v38 = vld [vmem:[#allocation8 + $0x28] sm:$0xff]  }
  0x7a   :  { %317 = vmatprep.subr.bf16.mxu0 %v959_v40  ;;  %v1032_v40 = vld [vmem:[#allocation8 + $0x30] sm:$0xff]  }
  0x7b   :  { %567 = vmatpush1.bf16.msra.mxu1 %v1003_v59 }
  0x7c   :  { %568 = vmatprep.subr.bf16.mxu1 %v1004_v60 }
  0x7d   :  { %318 = vmatpush1.bf16.msra.mxu0 %v961_v42  ;;  %v1034_v42 = vld [vmem:[#allocation8 + $0x38] sm:$0xff]  }
  0x7e   :  { %319 = vmatprep.subr.bf16.mxu0 %v962_v44  ;;  %v379_v44 = vrot.slane %v374_v43, %v125_v19 }
  0x7f   :  { %569 = vmatpush1.bf16.msra.mxu1 %v1006_v61 }
  0x80   :  { %570 = vmatprep.subr.bf16.mxu1 %v1007_v62 }
  0x81   :  { %320 = vmatpush1.bf16.msra.mxu0 %v964_v46 }
  0x82   :  { %321 = vmatprep.subr.bf16.mxu0 %v965_v48 }
  0x83   :  { %571 = vmatpush1.bf16.msra.mxu1 %v1009_v63 }
  0x84   :  { %572 = vmatprep.subr.bf16.mxu1 %v1010_v0  ;;  %v864_v0 = vld [vmem:[%s1298_s6] ss:$0 sm:$0xff] }
  0x85   :  { %322 = vmatpush1.bf16.msra.mxu0 %v967_v50 }
  0x86   :  { %323 = vmatprep.subr.bf16.mxu0 %v968_v52 }
  0x87   :  { %573 = vmatpush1.bf16.msra.mxu1 %v1012_v1 }
  0x88   :  { %574 = vmatprep.subr.bf16.mxu1 %v1013_v2 }
  0x89   :  { %324 = vmatpush1.bf16.msra.mxu0 %v970_v53 }
  0x8a   :  { %890 = vmatprep.subr.bf16.mxu0 %v1019_v6 }
  0x8b   :  { %575 = vmatpush1.bf16.msra.mxu1 %v1015_v3 }
  0x8c   :  { %326 = vmatmul.mubr.bf16.vlgmr.msra.gmra.mrb[0].mxu0 %v87_v58  ;;  %576 = vmatprep.subr.bf16.mxu1 %v1016_v4 }
  0x8d   :  { %891 = vmatpush3.bf16.msra.mxu0 %v1020_v7 }
  0x8e   :  { %892 = vmatprep.subr.bf16.mxu0 %v1021_v8 }
  0x8f   :  { %577 = vmatpush1.bf16.msra.mxu1 %v1018_v5 }
  0x91   :  { %893 = vmatpush3.bf16.msra.mxu0 %v1022_v9 }
  0x92   :  { %894 = vmatprep.subr.bf16.mxu0 %v1023_v10 }
  0x95   :  { %895 = vmatpush3.bf16.msra.mxu0 %v1024_v11 }
  0x96   :  { %896 = vmatprep.subr.bf16.mxu0 %v1025_v12 }
  0x99   :  { %897 = vmatpush3.bf16.msra.mxu0 %v1026_v13 }
  0x9a   :  { %898 = vmatprep.subr.bf16.mxu0 %v1027_v14 }
  0x9d   :  { %899 = vmatpush3.bf16.msra.mxu0 %v1028_v15 }
  0x9e   :  { %900 = vmatprep.subr.bf16.mxu0 %v1029_v16 }
  0xa1   :  { %901 = vmatpush3.bf16.msra.mxu0 %v1030_v38 }
  0xa2   :  { %902 = vmatprep.subr.bf16.mxu0 %v1031_v39 }
  0xa5   :  { %903 = vmatpush3.bf16.msra.mxu0 %v1032_v40 }
  0xa6   :  { %904 = vmatprep.subr.bf16.mxu0 %v1033_v41 }
  0xa9   :  { %905 = vmatpush3.bf16.msra.mxu0 %v1034_v42 }
 0x15f   :  { %v327_v24 = vpop.f32.mrb[0].mxu0 }
 0x160   :  { %v328_v25 = vadd.f32 %v327_v24, %v126_v22  ;;  %v329_v26 = vpop.f32.mrb[1].mxu0 }
 0x161   :  { %v330_v27 = vadd.f32 %v329_v26, %v130_v23  ;;  %v331_v28 = vpop.f32.mrb[2].mxu0 }
 0x162   :  { %v332_v29 = vadd.f32 %v331_v28, %v126_v22  ;;  %v333_v30 = vpop.f32.mrb[3].mxu0  ;;  %v336_v32 = vmax.f32 %v328_v25, 0.0 }
 0x163   :  { %v334_v31 = vadd.f32 %v333_v30, %v130_v23  ;;  %v337_v34 = vmax.f32 %v330_v27, 0.0 }
 0x164   :  { %v338_v33 = vmax.f32 %v332_v29, 0.0 }
 0x165   :  { %v339_v35 = vmax.f32 %v334_v31, 0.0 }
 0x166   :  { %v340_v36 = vpack.c.bf16 %v338_v33, %v336_v32 }
 0x167   :  { %v341_v37 = vpack.c.bf16 %v339_v35, %v337_v34 }
 0x169   :  { %578 = vmatprep.mubr.bf16.mxu1 %v341_v37 }
 0x16a   :  { %579 = vmatmul.mubr.bf16.vlgmr.msra.gmra.mrb[0].mxu1 %v340_v36 }
 0x23d   :  { %v580_v46 = vpop.f32.mrb[0].mxu1 }
 0x23e   :  { %v581_v47 = vadd.f32 %v580_v46, %v379_v44  ;;  %v582_v48 = vpop.f32.mrb[1].mxu1 }
 0x23f   :  { %v583_v49 = vadd.f32 %v582_v48, %v383_v45  ;;  %v584_v50 = vpop.f32.mrb[2].mxu1 }
 0x240   :  { %v585_v51 = vadd.f32 %v584_v50, %v379_v44  ;;  %v586_v52 = vpop.f32.mrb[3].mxu1  ;;  %v589_v54 = vmax.f32 %v581_v47, 0.0 }
 0x241   :  { %v587_v53 = vadd.f32 %v586_v52, %v383_v45  ;;  %v590_v56 = vmax.f32 %v583_v49, 0.0 }
 0x242   :  { %v591_v55 = vmax.f32 %v585_v51, 0.0 }
 0x243   :  { %v592_v57 = vmax.f32 %v587_v53, 0.0 }
 0x244   :  { %v593_v58 = vpack.c.bf16 %v591_v55, %v589_v54 }
 0x245   :  { %v594_v59 = vpack.c.bf16 %v592_v57, %v590_v56 }
 0x247   :  { %762 = vmatprep.mubr.bf16.mxu0 %v594_v59 }
 0x248   :  { %763 = vmatmul.mubr.bf16.vlgmr.msra.gmra.mrb[4].mxu0 %v593_v58 }
 0x31b   :  { %v906_v60 = vpop.f32.mrb[4].mxu0 }
 0x31c   :  { %v907_v61 = vpop.f32.mrb[5].mxu0 }
 0x31d   :  { %v908_v62 = vadd.f32 %v907_v61, %v906_v60  ;;  %v909_v63 = vpop.f32.mrb[6].mxu0 }
 0x31e   :  { %v910_v1 = vpop.f32.mrb[7].mxu0 }
 0x31f   :  { %v911_v2 = vadd.f32 %v910_v1, %v909_v63  ;;  %v765_v3 = vadd.f32 %v908_v62, %v864_v0 }
 0x321   :  { %v768_v4 = vadd.f32 %v911_v2, %v864_v0 }
 0x323   :  { %v888_v5 = vpack.c.bf16 %v768_v4, %v765_v3 }
 0x325   :  { %889 = vst [vmem:[#allocation10] sm:$0xff] %v888_v5  }
 0x326   :  { %1134 = shalt.err (!%p1131_p8)
}
 0x327   :  { %s1135_s6 = scalar_lea.hbm %s1299_s7, 128 }
 0x328   :  { %p1136_p9 = scmp.ne.s32.totalorder %s1299_s7, %s1135_s6  ;;  %p1139_p10 = scmp.lt.u32.totalorder %s1135_s6, %s1299_s7 }
 0x32a   :  { %p1141_p11 = pnand %p1139_p10, %p1136_p9 }
 0x32c   :  { %1144 = shalt.err (!%p1141_p11)
}
 0x32d   :  { %792 = dma.vmem_to_hbm [thread:$0]  %s787_s9, 128, %s1299_s7, [#allocation4], %s1161_s3, %s1161_s3, %s1162_s11  }
 0x32e   :  { %1151 = dma.done.wait [#allocation4], 128  }
 0x32f   :  { %1152 = vsyncadd [#allocation4], 4294967168 }
 0x330   :  { %796 = vsyncpa [#allocation3], 1 }
 0x331   :  { %797 = vsyncpa [#allocation6], 1 }
 0x332   :  { %798 = vsyncpa [#allocation9], 1 }
 0x333   :  { %799 = vsyncpa [#allocation4], 1 }

</bundles_post_ra>
